<compile_context>
chip_gen: v5e
topology: v5e:2x2
jax: 0.10.0
libtpu: 0.0.40
codegen_flags: <defaults>
</compile_context>

<pallas_src>
import functools

import jax
import jax.numpy as jnp
import numpy as np
from jax.experimental import pallas as pl
from jax.experimental.pallas import tpu as pltpu

RADIUS = 2  # module default; hard-wired as the flat 2x2 structuring element


def _opening_loss_kernel(x_ref, m_ref, out_ref, *, width: int, hw: int):
    """x_ref: (P, H*W) flattened planes; m_ref: (4, H*W) int32 boundary masks."""
    x = x_ref[...]
    if x.dtype not in (jnp.float32, jnp.bfloat16):
        x = x.astype(jnp.float32)  # min/max in native bf16 is exact; others upcast

    col_first = m_ref[0:1, :] != 0   # j == 0
    col_last  = m_ref[1:2, :] != 0   # j == W-1
    row_first = m_ref[2:3, :] != 0   # i == 0
    row_last  = m_ref[3:4, :] != 0   # i == H-1

    s_up    = width % hw
    s_left  = 1 % hw
    s_down  = (hw - width) % hw
    s_right = (hw - 1) % hw

    # Grey erosion, size=2: min over offsets {-1,0} x {-1,0}; reflect boundary
    # (x[-1] == x[0]).  Lane-axis rolls stay inside each plane's own row.
    up = jnp.where(row_first, x, pltpu.roll(x, shift=s_up, axis=1))       # x[i-1, j]
    e = jnp.minimum(x, up)
    left = jnp.where(col_first, e, pltpu.roll(e, shift=s_left, axis=1))   # e[i, j-1]
    e = jnp.minimum(e, left)

    # Grey dilation, size=2: max over offsets {0,+1} x {0,+1}; reflect boundary.
    down = jnp.where(row_last, e, pltpu.roll(e, shift=s_down, axis=1))    # e[i+1, j]
    d = jnp.maximum(e, down)
    right = jnp.where(col_last, d, pltpu.roll(d, shift=s_right, axis=1))  # d[i, j+1]
    d = jnp.maximum(d, right)

    diff = x.astype(jnp.float32) - d.astype(jnp.float32)
    partial = jnp.sum(diff * diff)
    # Independent, lane-dense partial-sum tile per grid step (no cross-step
    # dependency -> grid axis stays "parallel").  Wrapper reads [:, 0, 0].
    out_ref[...] = jnp.full(out_ref.shape, partial, dtype=jnp.float32)


def _vmem_limit_bytes() -> int:
    """Generation-aware scoped-VMEM limit: half of physical, capped at 64 MiB."""
    try:
        cap = pltpu.get_tpu_info().vmem_capacity_bytes
    except Exception:
        cap = 64 * 1024 * 1024  # conservative fallback (v7x per-TC VMEM)
    return int(min(cap // 2, 64 * 1024 * 1024))


def _planes_per_block(num_planes: int, plane_elems: int, in_itemsize: int,
                      vmem_limit: int) -> int:
    """Planes per grid block from an explicit per-plane VMEM byte model.

    Per plane: 2x double-buffered native-dtype input + ~5 live f32-sized
    temporaries inside the kernel.  The result is kept a multiple of 8 so the
    block's sublane (plane) dimension stays (8,128)-aligned; when there are
    enough planes it is capped so the grid has at least two blocks (feeds both
    v7x TensorCores; harmless on single-TC v5e/v6e).
    """
    per_plane = plane_elems * (2 * in_itemsize + 5 * 4)
    budget = int(vmem_limit * 0.7)
    p = max(1, budget // per_plane)
    if num_planes >= 16:
        p = min(p, pl.cdiv(num_planes, 2))        # keep >= 2 blocks
    p = max(8, (p // 8) * 8)                      # sublane alignment
    p = min(p, pl.cdiv(num_planes, 8) * 8)        # at most one padded array's worth
    return int(p)


def opening_loss_2d(labels: jax.Array) -> jax.Array:
    """labels: (N, C, H, W) class probabilities. Returns the scalar opening loss."""
    n, c, h, w = labels.shape
    b = n * c
    hw = h * w
    x = labels.reshape(b, hw)   # row-major flatten: free, lane axis becomes H*W

    vmem_limit = _vmem_limit_bytes()
    p = _planes_per_block(b, hw, labels.dtype.itemsize, vmem_limit)
    num_blocks = pl.cdiv(b, p)
    b_pad = num_blocks * p
    if b_pad != b:
        # Zero planes open to zero and contribute nothing to the partial sums.
        x = jnp.pad(x, ((0, b_pad - b), (0, 0)))
    # TODO(synk): planes too large for even an 8-plane block in VMEM (e.g.
    # 2048x2048 f32 under v7x's ~32 MiB scoped budget) would need lane-axis
    # tiling with a W-element halo; not required for typical segmentation maps.

    # Per-plane boundary masks (reflect handling), shared by every block.
    idx = np.arange(hw, dtype=np.int64)
    col = idx % w
    row = idx // w
    masks = jnp.asarray(
        np.stack([col == 0, col == w - 1, row == 0, row == h - 1]).astype(np.int32))

    kernel = functools.partial(_opening_loss_kernel, width=w, hw=hw)
    bytes_accessed = (b_pad * hw * labels.dtype.itemsize
                      + int(masks.size) * 4 + num_blocks * 8 * 128 * 4)

    partials = pl.pallas_call(
        kernel,
        out_shape=jax.ShapeDtypeStruct((num_blocks, 8, 128), jnp.float32),
        grid_spec=pltpu.PrefetchScalarGridSpec(
            num_scalar_prefetch=0,
            grid=(num_blocks,),
            in_specs=[
                pl.BlockSpec((p, hw), lambda i: (i, 0)),
                pl.BlockSpec((4, hw), lambda i: (0, 0)),   # constant block: fetched once
            ],
            out_specs=pl.BlockSpec((1, 8, 128), lambda i: (i, 0, 0)),
        ),
        compiler_params=pltpu.CompilerParams(
            dimension_semantics=("parallel",),   # disjoint per-block partial sums
            vmem_limit_bytes=vmem_limit,
        ),
        cost_estimate=pl.CostEstimate(
            flops=12 * b_pad * hw, transcendentals=0, bytes_accessed=bytes_accessed),
    )(x, masks)

    return jnp.sum(partials[:, 0, 0]) / jnp.float32(b * hw)


def _opening_loss_reference_np(labels: np.ndarray) -> np.ndarray:
    """Non-circular numpy reference: explicit 2x2-window erosion/dilation with
    edge padding (== 1-pixel 'reflect'), matching scipy grey_opening(size=2)."""
    x = np.asarray(labels, dtype=np.float32)
    n, c, h, w = x.shape
    opened = np.empty_like(x)
    for i in range(n):
        for j in range(c):
            f = x[i, j]
            fp = np.pad(f, ((1, 0), (1, 0)), mode="edge")
            e = np.minimum.reduce(
                [fp[1:, 1:], fp[:-1, 1:], fp[1:, :-1], fp[:-1, :-1]])   # {-1,0}^2
            ep = np.pad(e, ((0, 1), (0, 1)), mode="edge")
            opened[i, j] = np.maximum.reduce(
                [ep[:-1, :-1], ep[1:, :-1], ep[:-1, 1:], ep[1:, 1:]])   # {0,+1}^2
    return np.mean((x - opened) ** 2)


if __name__ == "__main__":
    # Small, deterministic example consistent with the module's forward:
    # class probabilities of shape (batch, channels, H, W).
    key = jax.random.PRNGKey(0)
    labels = jax.random.uniform(key, (2, 4, 16, 16), dtype=jnp.float32)

    loss = jax.block_until_ready(opening_loss_2d(labels))

    ref = _opening_loss_reference_np(np.asarray(labels))
    np.testing.assert_allclose(np.asarray(loss), ref, rtol=1e-5, atol=1e-6)

    print("KERNEL_OK")
</pallas_src>

<mosaic_0001>
module attributes {stable_mosaic.version = 11 : i64} {
  func.func @_opening_loss_kernel(%arg0: i32, %arg1: memref<8x256xf32, #tpu.memory_space<vmem>>, %arg2: memref<4x256xi32, #tpu.memory_space<vmem>>, %arg3: memref<1x8x128xf32, #tpu.memory_space<vmem>>) attributes {dimension_semantics = [#tpu.dimension_semantics<parallel>], iteration_bounds = array<i64: 1>, scalar_prefetch = 0 : i64, scratch_operands = 0 : i64, tpu.core_type = #tpu.core_type<tc>, window_params = [{transform_indices = @transform_0, window_bounds = array<i64: 8, 256>}, {pipeline_mode = #tpu.pipeline_mode<synchronous>, transform_indices = @transform_1, window_bounds = array<i64: 4, 256>}, {transform_indices = @transform_2, window_bounds = array<i64: 1, 8, 128>}]} {
    %c0 = arith.constant 0 : index
    %c0_0 = arith.constant 0 : index
    %0 = vector.load %arg1[%c0, %c0_0] : memref<8x256xf32, #tpu.memory_space<vmem>>, vector<8x256xf32>
    %c0_1 = arith.constant 0 : index
    %c0_2 = arith.constant 0 : index
    %1 = vector.load %arg2[%c0_1, %c0_2] : memref<4x256xi32, #tpu.memory_space<vmem>>, vector<1x256xi32>
    %c0_i32 = arith.constant 0 : i32
    %2 = vector.broadcast %c0_i32 : i32 to vector<1x256xi32>
    %3 = arith.cmpi ne, %1, %2 : vector<1x256xi32>
    %c1 = arith.constant 1 : index
    %c0_3 = arith.constant 0 : index
    %4 = vector.load %arg2[%c1, %c0_3] : memref<4x256xi32, #tpu.memory_space<vmem>>, vector<1x256xi32>
    %c0_i32_4 = arith.constant 0 : i32
    %5 = vector.broadcast %c0_i32_4 : i32 to vector<1x256xi32>
    %6 = arith.cmpi ne, %4, %5 : vector<1x256xi32>
    %c2 = arith.constant 2 : index
    %c0_5 = arith.constant 0 : index
    %7 = vector.load %arg2[%c2, %c0_5] : memref<4x256xi32, #tpu.memory_space<vmem>>, vector<1x256xi32>
    %c0_i32_6 = arith.constant 0 : i32
    %8 = vector.broadcast %c0_i32_6 : i32 to vector<1x256xi32>
    %9 = arith.cmpi ne, %7, %8 : vector<1x256xi32>
    %c3 = arith.constant 3 : index
    %c0_7 = arith.constant 0 : index
    %10 = vector.load %arg2[%c3, %c0_7] : memref<4x256xi32, #tpu.memory_space<vmem>>, vector<1x256xi32>
    %c0_i32_8 = arith.constant 0 : i32
    %11 = vector.broadcast %c0_i32_8 : i32 to vector<1x256xi32>
    %12 = arith.cmpi ne, %10, %11 : vector<1x256xi32>
    %c16_i32 = arith.constant 16 : i32
    %13 = tpu.dynamic_rotate %0 by %c16_i32 dim 1 : vector<8x256xf32>, i32 -> vector<8x256xf32>
    %14 = vector.shape_cast %9 : vector<1x256xi1> to vector<1x256xi1>
    %15 = vector.broadcast %14 : vector<1x256xi1> to vector<8x256xi1>
    %16 = arith.select %15, %0, %13 : vector<8x256xi1>, vector<8x256xf32>
    %17 = arith.minimumf %0, %16 : vector<8x256xf32>
    %c1_i32 = arith.constant 1 : i32
    %18 = tpu.dynamic_rotate %17 by %c1_i32 dim 1 : vector<8x256xf32>, i32 -> vector<8x256xf32>
    %19 = vector.shape_cast %3 : vector<1x256xi1> to vector<1x256xi1>
    %20 = vector.broadcast %19 : vector<1x256xi1> to vector<8x256xi1>
    %21 = arith.select %20, %17, %18 : vector<8x256xi1>, vector<8x256xf32>
    %22 = arith.minimumf %17, %21 : vector<8x256xf32>
    %c240_i32 = arith.constant 240 : i32
    %23 = tpu.dynamic_rotate %22 by %c240_i32 dim 1 : vector<8x256xf32>, i32 -> vector<8x256xf32>
    %24 = vector.shape_cast %12 : vector<1x256xi1> to vector<1x256xi1>
    %25 = vector.broadcast %24 : vector<1x256xi1> to vector<8x256xi1>
    %26 = arith.select %25, %22, %23 : vector<8x256xi1>, vector<8x256xf32>
    %27 = arith.maximumf %22, %26 : vector<8x256xf32>
    %c255_i32 = arith.constant 255 : i32
    %28 = tpu.dynamic_rotate %27 by %c255_i32 dim 1 : vector<8x256xf32>, i32 -> vector<8x256xf32>
    %29 = vector.shape_cast %6 : vector<1x256xi1> to vector<1x256xi1>
    %30 = vector.broadcast %29 : vector<1x256xi1> to vector<8x256xi1>
    %31 = arith.select %30, %27, %28 : vector<8x256xi1>, vector<8x256xf32>
    %32 = arith.maximumf %27, %31 : vector<8x256xf32>
    %33 = arith.subf %0, %32 : vector<8x256xf32>
    %34 = arith.mulf %33, %33 : vector<8x256xf32>
    %35 = vector.shape_cast %34 : vector<8x256xf32> to vector<1x8x256xf32>
    %cst = arith.constant dense<0.000000e+00> : vector<1xf32>
    %36 = vector.multi_reduction <add>, %35, %cst [1, 2] : vector<1x8x256xf32> to vector<1xf32>
    %37 = vector.shape_cast %36 : vector<1xf32> to vector<1x1x1xf32>
    %38 = vector.extract %37[0, 0, 0] : f32 from vector<1x1x1xf32>
    %39 = vector.broadcast %38 : f32 to vector<1x8x128xf32>
    %c0_9 = arith.constant 0 : index
    %c0_10 = arith.constant 0 : index
    %c0_11 = arith.constant 0 : index
    %40 = vector.load %arg3[%c0_9, %c0_10, %c0_11] : memref<1x8x128xf32, #tpu.memory_space<vmem>>, vector<1x8x128xf32>
    tpu.vector_store %arg3[%c0_9, %c0_10, %c0_11], %39 {strides = array<i32>} : memref<1x8x128xf32, #tpu.memory_space<vmem>>, vector<1x8x128xf32>,
    return
  }
  func.func @transform_0(%arg0: i32) -> (i32, i32) {
    %c0_i32 = arith.constant 0 : i32
    %c0_i32_0 = arith.constant 0 : i32
    return %arg0, %c0_i32 : i32, i32
  }
  func.func @transform_1(%arg0: i32) -> (i32, i32) {
    %c0_i32 = arith.constant 0 : i32
    %c0_i32_0 = arith.constant 0 : i32
    %c0_i32_1 = arith.constant 0 : i32
    return %c0_i32, %c0_i32_0 : i32, i32
  }
  func.func @transform_2(%arg0: i32) -> (i32, i32, i32) {
    %c0_i32 = arith.constant 0 : i32
    %c0_i32_0 = arith.constant 0 : i32
    %c0_i32_1 = arith.constant 0 : i32
    return %arg0, %c0_i32, %c0_i32_0 : i32, i32, i32
  }
}

</mosaic_0001>

<bundles_post_ra>
// kernel: tpu_custom_call.1
= control target key start
LH: loop header
LB: loop body
LE: loop exit
PB: predicated region body
PF: predicated region fallthrough
CT: control target
= control target key end

     0   :  { %7 = vsyncpa [#allocation3], 0  ;;  %s291_s0 = inlined_call_operand.hbm [shape: f32[8,256], index: 0, kind: input, shape index: {}]   ;;  %s292_s1 = inlined_call_operand.hbm [shape: s32[4,256], index: 1, kind: input, shape index: {}]   ;;  %s293_s2 = inlined_call_operand.hbm [shape: f32[1,8,128], index: 2, kind: output, shape index: {}]  }
   0x1   :  { %8 = vsyncpa [#allocation6], 0 }
   0x2   :  { %9 = vsyncpa [#allocation4], 0  ;;  %s15_s11 = sshll.u32 %s291_s0, 4  ;;  %s241_s12 = smov [#allocation2]   ;;  %s16_s11 = int_to_ptr.hbm [resolvable:$true] %s15_s11 }
   0x3   :  { %s17_s13 = sshll.u32 %s241_s12, 4  ;;  %s26_s16 = sshll.u32 %s292_s1, 4  ;;  %s18_s13 = int_to_ptr.vmem [resolvable:$true] %s17_s13  ;;  %s27_s16 = int_to_ptr.hbm [resolvable:$true] %s26_s16 }
   0x4   :  { %20 = dma.hbm_to_vmem [thread:$0]  %s16_s11, 256, %s18_s13, [#allocation3]  }
   0x5   :  { %s242_s17 = smov [#allocation5]  }
   0x6   :  { %s28_s18 = sshll.u32 %s242_s17, 4  ;;  %s29_s18 = int_to_ptr.vmem [resolvable:$true] %s28_s18 }
   0x7   :  { %31 = dma.hbm_to_vmem [thread:$0]  %s27_s16, 128, %s29_s18, [#allocation6]  }
   0x8   :  { %235 = dma.done.wait [#allocation3], 256  }
   0x9   :  { %236 = vsyncadd [#allocation3], 4294967040 }
   0xa   :  { %237 = dma.done.wait [#allocation6], 128  }
   0xb   :  { %238 = vsyncadd [#allocation6], 4294967168  ;;  %v270_v0 = vld [vmem:[#allocation2] sm:$0xff]  ;;  %s243_s0 = smov 16   ;;  %v273_v1 = vld [vmem:[#allocation2 + $0x8] sm:$0xff]  ;;  %v57_v3 = vlaneseq  ;;  %v244_v5 = vmov 0  }
   0xc   :  { %53 = vrot.lane.b32.xlu0 %v270_v0, %s243_s0  ;;  %v48_v2 = vld [vmem:[#allocation5 + $0x2] ss:$4 sm:$0x3]  ;;  %s245_s1 = smov 1   ;;  %s246_s19 = smov 112  }
   0xd   :  { %vm49_vm0 = vcmp.ne.s32.totalorder %v48_v2, 0  ;;  %v276_v7 = vand.u32 127, %v57_v3  ;;  %v42_v17 = vld [vmem:[#allocation5] ss:$4 sm:$0x3]  ;;  %s247_s20 = smov 127  }
   0xe   :  { %v62_v6 = vsel %vm49_vm0, 1, %v244_v5  ;;  %vm43_vm4 = vcmp.ne.s32.totalorder %v42_v17, 0  ;;  %v51_v29 = vld [vmem:[#allocation5 + $0x3] ss:$4 sm:$0x3]  ;;  %s248_s21 = smov [#allocation7]  }
   0xf   :  { %v63_v8 = vperm.slane %v62_v6, 0  ;;  %vm59_vm1 = vcmp.lt.s32.totalorder %v276_v7, 16  ;;  %v64_v10 = vperm.slane %v62_v6, 1  ;;  %v78_v19 = vsel %vm43_vm4, 1, %v244_v5  ;;  %s140_s22 = sshll.u32 %s248_s21, 4  ;;  %s142_s25 = sshll.u32 %s293_s2, 4  ;;  %s141_s22 = int_to_ptr.vmem [resolvable:$true] %s140_s22  ;;  %s143_s25 = int_to_ptr.hbm [resolvable:$true] %s142_s25 }
  0x10   :  { %v79_v20 = vperm.slane %v78_v19, 0  ;;  %vm75_vm5 = vcmp.lt.s32.totalorder %v276_v7, 1  ;;  %v80_v22 = vperm.slane %v78_v19, 1  ;;  %vm52_vm8 = vcmp.ne.s32.totalorder %v51_v29, 0 }
  0x11   :  { %vm65_vm2 = vcmp.eq.s32.totalorder %v63_v8, 1  ;;  %vm66_vm3 = vcmp.eq.s32.totalorder %v64_v10, 1  ;;  %v94_v31 = vsel %vm52_vm8, 1, %v244_v5  ;;  %vm91_vm9 = vcmp.lt.s32.totalorder %v276_v7, 112 }
  0x12   :  { %vm81_vm6 = vcmp.eq.s32.totalorder %v79_v20, 1  ;;  %vm82_vm7 = vcmp.eq.s32.totalorder %v80_v22, 1  ;;  %v95_v32 = vperm.slane %v94_v31, 0  ;;  %v96_v33 = vperm.slane %v94_v31, 1 }
  0x13   :  { %v45_v41 = vld [vmem:[#allocation5 + $0x1] ss:$4 sm:$0x3]  ;;  %vm107_vm13 = vcmp.lt.s32.totalorder %v276_v7, 127 }
  0x14   :  { %55 = vrot.lane.b32.xlu0 %v273_v1, %s243_s0  ;;  %vm97_vm10 = vcmp.eq.s32.totalorder %v95_v32, 1  ;;  %vm98_vm11 = vcmp.eq.s32.totalorder %v96_v33, 1  ;;  %vm46_vm12 = vcmp.ne.s32.totalorder %v45_v41, 0 }
  0x15   :  { %v110_v42 = vsel %vm46_vm12, 1, %v244_v5 }
  0x16   :  { %v111_v43 = vperm.slane %v110_v42, 0  ;;  %v112_v44 = vperm.slane %v110_v42, 1 }
  0x18   :  { %vm113_vm14 = vcmp.eq.s32.totalorder %v111_v43, 1  ;;  %vm114_vm15 = vcmp.eq.s32.totalorder %v112_v44, 1 }
  0x7e   :  { %v54_v4 = vpop.permute.xlu0 %53 }
  0x86   :  { %v56_v9 = vpop.permute.xlu0 %55 }
  0x87   :  { %v61_v11 = vsel %vm59_vm1, %v56_v9, %v54_v4  ;;  %v60_v14 = vsel %vm59_vm1, %v54_v4, %v56_v9 }
  0x88   :  { %v67_v12 = vsel %vm65_vm2, %v270_v0, %v61_v11  ;;  %v68_v15 = vsel %vm66_vm3, %v273_v1, %v60_v14 }
  0x89   :  { %v69_v13 = vmin.f32 %v270_v0, %v67_v12  ;;  %v70_v16 = vmin.f32 %v273_v1, %v68_v15 }
  0x8b   :  { %71 = vrot.lane.b32.xlu1 %v69_v13, %s245_s1 }
  0x93   :  { %73 = vrot.lane.b32.xlu1 %v70_v16, %s245_s1 }
  0xfd   :  { %v72_v18 = vpop.permute.xlu1 %71 }
 0x105   :  { %v74_v21 = vpop.permute.xlu1 %73 }
 0x106   :  { %v77_v23 = vsel %vm75_vm5, %v74_v21, %v72_v18  ;;  %v76_v26 = vsel %vm75_vm5, %v72_v18, %v74_v21 }
 0x107   :  { %v83_v24 = vsel %vm81_vm6, %v69_v13, %v77_v23  ;;  %v84_v27 = vsel %vm82_vm7, %v70_v16, %v76_v26 }
 0x108   :  { %v85_v25 = vmin.f32 %v69_v13, %v83_v24  ;;  %v86_v28 = vmin.f32 %v70_v16, %v84_v27 }
 0x10a   :  { %87 = vrot.lane.b32.xlu2 %v85_v25, %s246_s19 }
 0x112   :  { %89 = vrot.lane.b32.xlu2 %v86_v28, %s246_s19 }
 0x164   :  { %v88_v30 = vpop.permute.xlu2 %87 }
 0x16c   :  { %v90_v34 = vpop.permute.xlu2 %89 }
 0x16d   :  { %v92_v35 = vsel %vm91_vm9, %v88_v30, %v90_v34  ;;  %v93_v36 = vsel %vm91_vm9, %v90_v34, %v88_v30 }
 0x16e   :  { %v99_v37 = vsel %vm97_vm10, %v85_v25, %v92_v35  ;;  %v100_v38 = vsel %vm98_vm11, %v86_v28, %v93_v36 }
 0x16f   :  { %v102_v39 = vmax.f32 %v86_v28, %v100_v38  ;;  %v101_v40 = vmax.f32 %v85_v25, %v99_v37 }
 0x171   :  { %105 = vrot.lane.b32.xlu1 %v102_v39, %s247_s20  ;;  %103 = vrot.lane.b32.xlu0 %v101_v40, %s247_s20 }
 0x1e3   :  { %v106_v45 = vpop.permute.xlu1 %105  ;;  %v104_v46 = vpop.permute.xlu0 %103 }
 0x1e4   :  { %v108_v47 = vsel %vm107_vm13, %v104_v46, %v106_v45  ;;  %v109_v48 = vsel %vm107_vm13, %v106_v45, %v104_v46 }
 0x1e5   :  { %v115_v49 = vsel %vm113_vm14, %v101_v40, %v108_v47  ;;  %v116_v50 = vsel %vm114_vm15, %v102_v39, %v109_v48 }
 0x1e6   :  { %v117_v51 = vmax.f32 %v101_v40, %v115_v49  ;;  %v118_v52 = vmax.f32 %v102_v39, %v116_v50 }
 0x1e8   :  { %v119_v53 = vsub.f32 %v270_v0, %v117_v51  ;;  %v120_v54 = vsub.f32 %v273_v1, %v118_v52 }
 0x1ea   :  { %v121_v55 = vmul.f32 %v119_v53, %v119_v53  ;;  %v122_v56 = vmul.f32 %v120_v54, %v120_v54 }
 0x1ec   :  { %v123_v57 = vadd.f32 %v122_v56, %v121_v55 }
 0x1ee   :  { %124 = vadd.xlane.f32.xlu2 %v123_v57 }
 0x261   :  { %v125_v58 = vpop.xlane.xlu2 %124 }
 0x262   :  { %v126_v59 = vrot.slane %v125_v58, 4 }
 0x264   :  { %v127_v60 = vadd.f32 %v126_v59, %v125_v58 }
 0x266   :  { %v128_v61 = vrot.slane %v127_v60, 2 }
 0x268   :  { %v129_v62 = vadd.f32 %v128_v61, %v127_v60 }
 0x26a   :  { %v130_v63 = vrot.slane %v129_v62, 1 }
 0x26c   :  { %v131_v2 = vadd.f32 %v130_v63, %v129_v62 }
 0x26e   :  { %153 = vpush %v131_v2 }
 0x29f   :  { %s154_s26 = spop %153 }
 0x2a0   :  { %v133_v0 = vstv %s154_s26 }
 0x2a1   :  { %134 = vst [vmem:[#allocation7] sm:$0xff] %v133_v0 }
 0x2a2   :  { %145 = dma.vmem_to_hbm [thread:$0]  %s141_s22, 128, %s143_s25, [#allocation4]  }
 0x2a3   :  { %239 = dma.done.wait [#allocation4], 128  }
 0x2a4   :  { %240 = vsyncadd [#allocation4], 4294967168 }
 0x2a5   :  { %150 = vsyncpa [#allocation3], 1 }
 0x2a6   :  { %151 = vsyncpa [#allocation6], 1 }
 0x2a7   :  { %152 = vsyncpa [#allocation4], 1 }

</bundles_post_ra>
